<compile_context>
chip_gen: v6e
topology: v6e:2x2x1
jax: 0.10.0
libtpu: 0.0.40
codegen_flags: <defaults>
</compile_context>

<pallas_src>
import functools
import math

import jax
import jax.numpy as jnp
from jax import lax
from jax.experimental import pallas as pl
from jax.experimental.pallas import tpu as pltpu


def _round_up(x, m):
    return ((x + m - 1) // m) * m


def _pick_block_n(N, D, target_hbm_bytes=1 << 20, max_tile_vmem_bytes=4 << 20):
    """Rows per x tile: ~1 MiB of HBM traffic and <=4 MiB of lane-padded VMEM
    (review #1), multiple of 8 (512 when possible), capped at the padded N."""
    rows = min(target_hbm_bytes // (D * 4),
               max_tile_vmem_bytes // (max(D, 128) * 4))
    rows = max(8, (rows // 8) * 8)
    if rows >= 512:
        rows = (rows // 512) * 512
    return min(rows, _round_up(N, 8))


def _vmem_limit_bytes():
    """Per-generation scoped-VMEM budget (review #8): ~85% of physical VMEM
    (~108 MiB on v5e/v6e with 128 MiB, ~54 MiB on v7x with 64 MiB)."""
    try:
        info = pltpu.get_tpu_info()
        cap = (getattr(info, "vmem_capacity_bytes", None)
               or getattr(info, "vmem_bytes", None))
        if cap:
            return int(int(cap) * 0.85)
    except Exception:
        pass
    return 32 * 1024 * 1024  # conservative fallback, safe on every generation


def _qattn_kernel(x_ref, sv_ref, mask_ref, out_ref, mrow_ref, m_scr, l_scr, *, clamp):
    """One grid step streams a (TN, D) tile of `inputs`.

    x_ref    (TN, D)  current x tile (double-buffered by the Pallas pipeline)
    sv_ref   (2, D)   resident folded weights: [wk@(q@wq)/sqrt(H); wv@wo]
    mask_ref (1, TN)  streamed int mask tile (0 => masked); bias built in-kernel
    out_ref  (nt, TN) resident: unnormalized e*u during streaming, final logits
    mrow_ref (nt, 1)  running-max snapshot taken at each tile (for the rescale)
    m_scr    (1, 1)   running max          l_scr (1, 1)  running (rescaled) sum
    """
    j = pl.program_id(0)
    last = pl.num_programs(0) - 1

    @pl.when(j == 0)
    def _init():
        m_scr[...] = jnp.full_like(m_scr, -jnp.inf)
        l_scr[...] = jnp.zeros_like(l_scr)

    # Fused score/value matvec pair on the MXU: (2, D) x (TN, D), contracting the
    # last dims of both operands -> (2, TN).  Result rows are already lane-dense,
    # so no transpose is needed anywhere (review #7).
    prod = lax.dot_general(sv_ref[...], x_ref[...],
                           dimension_numbers=(((1,), (1,)), ((), ())),
                           preferred_element_type=jnp.float32)          # (2, TN)

    # Additive mask bias built per tile (hidden under the DMA): 0 / -1e30.
    bias = jnp.where(mask_ref[...] == 0, -1e30, 0.0).astype(jnp.float32)  # (1, TN)
    scores = prod[0:1, :] + bias                                          # (1, TN)

    # Online softmax (review #6): exp happens here, under the DMA-bound stream.
    m_prev = m_scr[...]                                                   # (1, 1)
    m_new = jnp.maximum(m_prev, jnp.max(scores, axis=1, keepdims=True))   # (1, 1)
    e = jnp.exp(scores - m_new)                                           # (1, TN)
    l_scr[...] = jnp.exp(m_prev - m_new) * l_scr[...] + jnp.sum(e, axis=1,
                                                                keepdims=True)
    m_scr[...] = m_new
    mrow_ref[pl.ds(j, 1), :] = m_new
    # Store the fused unnormalized (weight * value-out) row; the global rescale is
    # applied at finalize, so only ONE O(N) VMEM buffer is kept (reviews #3/#4).
    out_ref[pl.ds(j, 1), :] = e * prod[1:2, :]

    @pl.when(j == last)
    def _finalize():
        # Per-tile correction exp(m_j - m_final) / l_final, then clamp*tanh.
        corr = jnp.exp(mrow_ref[...] - m_scr[...]) * (1.0 / l_scr[...])   # (nt, 1)
        out_ref[...] = clamp * jnp.tanh(out_ref[...] * corr)


def query_based_attention(inputs, query, mask, wq, wk, wv, wo, clamp_value=10.0):
    """inputs: (N, D) f32; query: (D,); mask: (N,) ints (0 => masked);
    wq/wk/wv: (D, H) pre-transposed so x @ W == PyTorch Linear(x); wo: (H, 1).
    Returns (N,) f32 logits = C * tanh(W_out(softmax(QK^T/sqrt(H)).T * V))."""
    N, D = inputs.shape
    H = wq.shape[1]
    inv_scale = 1.0 / math.sqrt(H)

    TN = _pick_block_n(N, D)
    N_pad = _round_up(N, TN)
    nt = N_pad // TN

    # Keep f32 end-to-end (review #9): the kernel is DMA-bound; a wrapper cast to
    # bf16 would add an extra HBM read+write pass.
    x = inputs.astype(jnp.float32)
    if N_pad != N:
        x = jnp.pad(x, ((0, N_pad - N), (0, 0)))

    # Raw int mask, streamed per tile; padded tail positions are masked (value 0).
    mask_i = mask.reshape(-1).astype(jnp.int32)
    if N_pad != N:
        mask_i = jnp.pad(mask_i, (0, N_pad - N))
    mask_i = mask_i.reshape(nt, 1, TN)

    # Weight fold done once in the wrapper (review #2): two tiny XLA matmuls.
    #   scores = x @ (wk @ (q @ wq)) * 1/sqrt(H);   V @ wo = x @ (wv @ wo)
    wq32, wk32, wv32, wo32 = (w.astype(jnp.float32) for w in (wq, wk, wv, wo))
    q32 = query.reshape(-1).astype(jnp.float32)
    s_vec = (wk32 @ (q32 @ wq32)) * inv_scale            # (D,)
    v_vec = (wv32 @ wo32).reshape(-1)                    # (D,)
    sv = jnp.stack([s_vec, v_vec], axis=0)               # (2, D)

    kernel = functools.partial(_qattn_kernel, clamp=float(clamp_value))

    grid_spec = pltpu.PrefetchScalarGridSpec(
        num_scalar_prefetch=0,
        grid=(nt,),
        in_specs=[
            pl.BlockSpec((TN, D), lambda j: (j, 0)),            # x: streamed over N
            pl.BlockSpec((2, D), lambda j: (0, 0)),             # folded weights (resident)
            pl.BlockSpec((None, 1, TN), lambda j: (j, 0, 0)),   # mask: streamed per tile
        ],
        out_specs=pl.BlockSpec((nt, TN), lambda j: (0, 0)),     # lane-dense, resident
        scratch_shapes=[
            pltpu.VMEM((nt, 1), jnp.float32),    # per-tile running-max snapshots
            pltpu.VMEM((1, 1), jnp.float32),     # running max
            pltpu.VMEM((1, 1), jnp.float32),     # running (rescaled) sum
        ],
    )

    out = pl.pallas_call(
        kernel,
        out_shape=jax.ShapeDtypeStruct((nt, TN), jnp.float32),
        grid_spec=grid_spec,
        compiler_params=pltpu.CompilerParams(
            dimension_semantics=("arbitrary",),     # softmax state carried over N tiles
            vmem_limit_bytes=_vmem_limit_bytes(),   # per-generation budget (review #8)
        ),
    )(x, sv, mask_i)

    return out.reshape(-1)[:N]


def _reference(inputs, query, mask, wq, wk, wv, wo, clamp_value=10.0):
    """Pure-JAX reference mirroring the PyTorch forward exactly."""
    H = wq.shape[1]
    Q = (query @ wq)[None, :]                     # (1, H)
    K = inputs @ wk                               # (N, H)
    V = inputs @ wv                               # (N, H)
    scores = (Q @ K.T) / jnp.sqrt(jnp.float32(H))
    scores = jnp.where(mask[None, :] == 0, -jnp.inf, scores)
    w = jax.nn.softmax(scores, axis=-1)
    attended = w.T * V
    logits = (attended @ wo)[:, 0]
    return clamp_value * jnp.tanh(logits)


if __name__ == "__main__":
    # Small, deterministic shapes: N=8 sequence items, input_dim=32, hidden_dim=32.
    N, D, H = 8, 32, 32
    key = jax.random.PRNGKey(0)
    k_in, k_q, k_wq, k_wk, k_wv, k_wo = jax.random.split(key, 6)

    inputs = jax.random.normal(k_in, (N, D), dtype=jnp.float32)
    query = jax.random.normal(k_q, (D,), dtype=jnp.float32)
    # Mask with a couple of zeroed-out positions (0 => masked, matching mask == 0).
    mask = jnp.array([1, 1, 0, 1, 1, 0, 1, 1], dtype=jnp.int32)

    # Deterministic parameter init (nn.Linear-like uniform scale), stored transposed.
    bound = 1.0 / math.sqrt(D)
    wq = jax.random.uniform(k_wq, (D, H), jnp.float32, -bound, bound)
    wk = jax.random.uniform(k_wk, (D, H), jnp.float32, -bound, bound)
    wv = jax.random.uniform(k_wv, (D, H), jnp.float32, -bound, bound)
    bound_o = 1.0 / math.sqrt(H)
    wo = jax.random.uniform(k_wo, (H, 1), jnp.float32, -bound_o, bound_o)

    out = query_based_attention(inputs, query, mask, wq, wk, wv, wo, clamp_value=10.0)
    out = jax.block_until_ready(out)

    ref = _reference(inputs, query, mask, wq, wk, wv, wo, clamp_value=10.0)
    assert out.shape == (N,)
    # Exact divide in the softmax normalizer now; the only deviation from the
    # reference is the f32 rounding-order change from the algebraic weight fold
    # and the online softmax, so the tolerance is tight.
    assert jnp.allclose(out, ref, atol=1e-4, rtol=1e-4), (out, ref)

    print("KERNEL_OK")
</pallas_src>

<mosaic_0001>
module attributes {stable_mosaic.version = 11 : i64} {
  func.func @_qattn_kernel(%arg0: i32, %arg1: memref<8x32xf32, #tpu.memory_space<vmem>>, %arg2: memref<2x32xf32, #tpu.memory_space<vmem>>, %arg3: memref<1x1x8xi32, #tpu.memory_space<vmem>>, %arg4: memref<1x8xf32, #tpu.memory_space<vmem>>, %arg5: memref<1x1xf32, #tpu.memory_space<vmem>>, %arg6: memref<1x1xf32, #tpu.memory_space<vmem>>, %arg7: memref<1x1xf32, #tpu.memory_space<vmem>>) attributes {dimension_semantics = [#tpu.dimension_semantics<arbitrary>], iteration_bounds = array<i64: 1>, scalar_prefetch = 0 : i64, scratch_operands = 3 : i64, tpu.core_type = #tpu.core_type<tc>, window_params = [{transform_indices = @transform_0, window_bounds = array<i64: 8, 32>}, {pipeline_mode = #tpu.pipeline_mode<synchronous>, transform_indices = @transform_1, window_bounds = array<i64: 2, 32>}, {transform_indices = @transform_2, window_bounds = array<i64: 1, 1, 8>}, {pipeline_mode = #tpu.pipeline_mode<synchronous>, transform_indices = @transform_3, window_bounds = array<i64: 1, 8>}]} {
    %c0_i32 = arith.constant 0 : i32
    %0 = arith.cmpi eq, %arg0, %c0_i32 : i32
    %1 = arith.extui %0 : i1 to i32
    %c0_i32_0 = arith.constant 0 : i32
    %2 = arith.cmpi ne, %1, %c0_i32_0 : i32
    scf.if %2 {
      %cst_24 = arith.constant 0xFF800000 : f32
      %40 = vector.broadcast %cst_24 : f32 to vector<1x1xf32>
      %c0_25 = arith.constant 0 : index
      %c0_26 = arith.constant 0 : index
      %41 = vector.load %arg6[%c0_25, %c0_26] : memref<1x1xf32, #tpu.memory_space<vmem>>, vector<1x1xf32>
      tpu.vector_store %arg6[%c0_25, %c0_26], %40 {strides = array<i32>} : memref<1x1xf32, #tpu.memory_space<vmem>>, vector<1x1xf32>,
      %cst_27 = arith.constant 0.000000e+00 : f32
      %42 = vector.broadcast %cst_27 : f32 to vector<1x1xf32>
      %c0_28 = arith.constant 0 : index
      %c0_29 = arith.constant 0 : index
      %43 = vector.load %arg7[%c0_28, %c0_29] : memref<1x1xf32, #tpu.memory_space<vmem>>, vector<1x1xf32>
      tpu.vector_store %arg7[%c0_28, %c0_29], %42 {strides = array<i32>} : memref<1x1xf32, #tpu.memory_space<vmem>>, vector<1x1xf32>,
    } else {
    }
    %c0 = arith.constant 0 : index
    %c0_1 = arith.constant 0 : index
    %3 = vector.load %arg2[%c0, %c0_1] : memref<2x32xf32, #tpu.memory_space<vmem>>, vector<2x32xf32>
    %c0_2 = arith.constant 0 : index
    %c0_3 = arith.constant 0 : index
    %4 = vector.load %arg1[%c0_2, %c0_3] : memref<8x32xf32, #tpu.memory_space<vmem>>, vector<8x32xf32>
    %cst = arith.constant dense<0.000000e+00> : vector<2x8xf32>
    %5 = tpu.matmul %3, %4, %cst {dimension_numbers = #tpu.dot_dimension_numbers<[1], [1], [0], [0], [0, 0, 1, 0], [], []>} : vector<2x32xf32>, vector<8x32xf32>, vector<2x8xf32> -> vector<2x8xf32>
    %c0_4 = arith.constant 0 : index
    %c0_5 = arith.constant 0 : index
    %c0_6 = arith.constant 0 : index
    %6 = vector.load %arg3[%c0_4, %c0_5, %c0_6] : memref<1x1x8xi32, #tpu.memory_space<vmem>>, vector<1x1x8xi32>
    %7 = vector.shape_cast %6 : vector<1x1x8xi32> to vector<1x8xi32>
    %c0_i32_7 = arith.constant 0 : i32
    %8 = vector.broadcast %c0_i32_7 : i32 to vector<1x8xi32>
    %9 = arith.cmpi eq, %7, %8 : vector<1x8xi32>
    %cst_8 = arith.constant -1.000000e+30 : f32
    %cst_9 = arith.constant 0.000000e+00 : f32
    %10 = vector.broadcast %cst_8 : f32 to vector<1x8xf32>
    %11 = vector.broadcast %cst_9 : f32 to vector<1x8xf32>
    %12 = arith.select %9, %10, %11 : vector<1x8xi1>, vector<1x8xf32>
    %13 = vector.extract_strided_slice %5 {offsets = [0, 0], sizes = [1, 8], strides = [1, 1]} : vector<2x8xf32> to vector<1x8xf32>
    %14 = arith.addf %13, %12 : vector<1x8xf32>
    %c0_10 = arith.constant 0 : index
    %c0_11 = arith.constant 0 : index
    %15 = vector.load %arg6[%c0_10, %c0_11] : memref<1x1xf32, #tpu.memory_space<vmem>>, vector<1x1xf32>
    %cst_12 = arith.constant dense<0xFF800000> : vector<1xf32>
    %16 = vector.multi_reduction <maximumf>, %14, %cst_12 [1] : vector<1x8xf32> to vector<1xf32>
    %17 = vector.shape_cast %16 : vector<1xf32> to vector<1x1xf32>
    %18 = arith.maximumf %15, %17 : vector<1x1xf32>
    %19 = vector.broadcast %18 : vector<1x1xf32> to vector<1x8xf32>
    %20 = arith.subf %14, %19 : vector<1x8xf32>
    %21 = math.exp %20 : vector<1x8xf32>
    %22 = arith.subf %15, %18 : vector<1x1xf32>
    %23 = math.exp %22 : vector<1x1xf32>
    %c0_13 = arith.constant 0 : index
    %c0_14 = arith.constant 0 : index
    %24 = vector.load %arg7[%c0_13, %c0_14] : memref<1x1xf32, #tpu.memory_space<vmem>>, vector<1x1xf32>
    %25 = arith.mulf %23, %24 : vector<1x1xf32>
    %cst_15 = arith.constant dense<0.000000e+00> : vector<1xf32>
    %26 = vector.multi_reduction <add>, %21, %cst_15 [1] : vector<1x8xf32> to vector<1xf32>
    %27 = vector.shape_cast %26 : vector<1xf32> to vector<1x1xf32>
    %28 = arith.addf %25, %27 : vector<1x1xf32>
    %c0_16 = arith.constant 0 : index
    %c0_17 = arith.constant 0 : index
    %29 = vector.load %arg7[%c0_16, %c0_17] : memref<1x1xf32, #tpu.memory_space<vmem>>, vector<1x1xf32>
    tpu.vector_store %arg7[%c0_16, %c0_17], %28 {strides = array<i32>} : memref<1x1xf32, #tpu.memory_space<vmem>>, vector<1x1xf32>,
    %c0_18 = arith.constant 0 : index
    %c0_19 = arith.constant 0 : index
    %30 = vector.load %arg6[%c0_18, %c0_19] : memref<1x1xf32, #tpu.memory_space<vmem>>, vector<1x1xf32>
    tpu.vector_store %arg6[%c0_18, %c0_19], %18 {strides = array<i32>} : memref<1x1xf32, #tpu.memory_space<vmem>>, vector<1x1xf32>,
    %31 = arith.index_cast %arg0 : i32 to index
    %c0_20 = arith.constant 0 : index
    %32 = vector.load %arg5[%31, %c0_20] : memref<1x1xf32, #tpu.memory_space<vmem>>, vector<1x1xf32>
    tpu.vector_store %arg5[%31, %c0_20], %18 {strides = array<i32>} : memref<1x1xf32, #tpu.memory_space<vmem>>, vector<1x1xf32>,
    %33 = vector.extract_strided_slice %5 {offsets = [1, 0], sizes = [1, 8], strides = [1, 1]} : vector<2x8xf32> to vector<1x8xf32>
    %34 = arith.mulf %21, %33 : vector<1x8xf32>
    %35 = arith.index_cast %arg0 : i32 to index
    %c0_21 = arith.constant 0 : index
    %36 = vector.load %arg4[%35, %c0_21] : memref<1x8xf32, #tpu.memory_space<vmem>>, vector<1x8xf32>
    tpu.vector_store %arg4[%35, %c0_21], %34 {strides = array<i32>} : memref<1x8xf32, #tpu.memory_space<vmem>>, vector<1x8xf32>,
    %c0_i32_22 = arith.constant 0 : i32
    %37 = arith.cmpi eq, %arg0, %c0_i32_22 : i32
    %38 = arith.extui %37 : i1 to i32
    %c0_i32_23 = arith.constant 0 : i32
    %39 = arith.cmpi ne, %38, %c0_i32_23 : i32
    scf.if %39 {
      %c0_24 = arith.constant 0 : index
      %c0_25 = arith.constant 0 : index
      %40 = vector.load %arg5[%c0_24, %c0_25] : memref<1x1xf32, #tpu.memory_space<vmem>>, vector<1x1xf32>
      %c0_26 = arith.constant 0 : index
      %c0_27 = arith.constant 0 : index
      %41 = vector.load %arg6[%c0_26, %c0_27] : memref<1x1xf32, #tpu.memory_space<vmem>>, vector<1x1xf32>
      %42 = arith.subf %40, %41 : vector<1x1xf32>
      %43 = math.exp %42 : vector<1x1xf32>
      %c0_28 = arith.constant 0 : index
      %c0_29 = arith.constant 0 : index
      %44 = vector.load %arg7[%c0_28, %c0_29] : memref<1x1xf32, #tpu.memory_space<vmem>>, vector<1x1xf32>
      %cst_30 = arith.constant 1.000000e+00 : f32
      %45 = vector.broadcast %cst_30 : f32 to vector<1x1xf32>
      %46 = arith.divf %45, %44 : vector<1x1xf32>
      %47 = arith.mulf %43, %46 : vector<1x1xf32>
      %c0_31 = arith.constant 0 : index
      %c0_32 = arith.constant 0 : index
      %48 = vector.load %arg4[%c0_31, %c0_32] : memref<1x8xf32, #tpu.memory_space<vmem>>, vector<1x8xf32>
      %49 = vector.broadcast %47 : vector<1x1xf32> to vector<1x8xf32>
      %50 = arith.mulf %48, %49 : vector<1x8xf32>
      %51 = math.tanh %50 : vector<1x8xf32>
      %cst_33 = arith.constant 1.000000e+01 : f32
      %52 = vector.broadcast %cst_33 : f32 to vector<1x8xf32>
      %53 = arith.mulf %52, %51 : vector<1x8xf32>
      %c0_34 = arith.constant 0 : index
      %c0_35 = arith.constant 0 : index
      %54 = vector.load %arg4[%c0_34, %c0_35] : memref<1x8xf32, #tpu.memory_space<vmem>>, vector<1x8xf32>
      tpu.vector_store %arg4[%c0_34, %c0_35], %53 {strides = array<i32>} : memref<1x8xf32, #tpu.memory_space<vmem>>, vector<1x8xf32>,
    } else {
    }
    return
  }
  func.func @transform_0(%arg0: i32) -> (i32, i32) {
    %c0_i32 = arith.constant 0 : i32
    %c0_i32_0 = arith.constant 0 : i32
    return %arg0, %c0_i32 : i32, i32
  }
  func.func @transform_1(%arg0: i32) -> (i32, i32) {
    %c0_i32 = arith.constant 0 : i32
    %c0_i32_0 = arith.constant 0 : i32
    %c0_i32_1 = arith.constant 0 : i32
    return %c0_i32, %c0_i32_0 : i32, i32
  }
  func.func @transform_2(%arg0: i32) -> (i32, i32, i32) {
    %c0_i32 = arith.constant 0 : i32
    %c0_i32_0 = arith.constant 0 : i32
    %c0_i32_1 = arith.constant 0 : i32
    return %arg0, %c0_i32, %c0_i32_0 : i32, i32, i32
  }
  func.func @transform_3(%arg0: i32) -> (i32, i32) {
    %c0_i32 = arith.constant 0 : i32
    %c0_i32_0 = arith.constant 0 : i32
    %c0_i32_1 = arith.constant 0 : i32
    return %c0_i32, %c0_i32_0 : i32, i32
  }
}

</mosaic_0001>

<bundles_post_ra>
// kernel: tpu_custom_call.1
= control target key start
LH: loop header
LB: loop body
LE: loop exit
PB: predicated region body
PF: predicated region fallthrough
CT: control target
= control target key end

     0   :  { %8 = vsyncpa [#allocation6], 0  ;;  %s349_s0 = inlined_call_operand.hbm [shape: f32[8,32], index: 0, kind: input, shape index: {}]   ;;  %s350_s1 = inlined_call_operand.hbm [shape: f32[2,32], index: 1, kind: input, shape index: {}]   ;;  %s351_s2 = inlined_call_operand.vmem [shape: s32[1,1,8], index: 2, kind: input, shape index: {}]   ;;  %s352_s3 = inlined_call_operand.hbm [shape: f32[1,8], index: 3, kind: output, shape index: {}]  }
   0x1   :  { %9 = vsyncpa [#allocation9], 0 }
   0x2   :  { %10 = vsyncpa [#allocation7], 0  ;;  %s301_s12 = smov [#allocation5]   ;;  %s302_s14 = smov [#allocation8]  }
   0x3   :  { %s17_s13 = sshll.u32 %s301_s12, 4  ;;  %s27_s15 = sshll.u32 %s302_s14, 4  ;;  %s18_s13 = int_to_ptr.vmem [resolvable:$true] %s17_s13  ;;  %s28_s15 = int_to_ptr.vmem [resolvable:$true] %s27_s15 }
   0x4   :  { %s243_s16 = scalar_lea.vmem %s18_s13, 128  ;;  %p248_p1 = scmp.lt.s32.totalorder %s18_s13, %s18_s13 }
   0x5   :  { %p244_p0 = scmp.ne.s32.totalorder %s18_s13, %s243_s16  ;;  %p249_p2 = scmp.lt.s32.totalorder %s243_s16, %s243_s16 }
   0x7   :  { %p250_p3 = por %p249_p2, %p248_p1 }
   0x9   :  { %p251_p4 = pnand %p250_p3, %p244_p0 }
   0xb   :  { %254 = shalt.err (!%p251_p4)
}
   0xc   :  { %20 = dma.hbm_to_vmem [thread:$0]  %s349_s0, 128, %s18_s13, [#allocation6]  }
   0xd   :  { %s263_s19 = scalar_lea.vmem %s28_s15, 32  ;;  %p268_p6 = scmp.lt.s32.totalorder %s28_s15, %s28_s15 }
   0xe   :  { %p264_p5 = scmp.ne.s32.totalorder %s28_s15, %s263_s19  ;;  %p269_p7 = scmp.lt.s32.totalorder %s263_s19, %s263_s19 }
  0x10   :  { %p270_p8 = por %p269_p7, %p268_p6 }
  0x12   :  { %p271_p9 = pnand %p270_p8, %p264_p5 }
  0x14   :  { %274 = shalt.err (!%p271_p9)
}
  0x15   :  { %30 = dma.hbm_to_vmem [thread:$0]  %s350_s1, 32, %s28_s15, [#allocation9]  }
  0x16   :  { %295 = dma.done.wait [#allocation6], 128  }
  0x17   :  { %296 = vsyncadd [#allocation6], 4294967168 }
  0x18   :  { %297 = dma.done.wait [#allocation9], 32  }
  0x19   :  { %298 = vsyncadd [#allocation9], 4294967264  ;;  %vm43_vm0 = vcmask 0   ;;  %v303_v0 = vmov 0.0   ;;  %vm304_vm1 = vmmov 0   ;;  %vm48_vm2 = vcmask 261120  }
  0x1a   :  { %45 = vst.msk [vmem:[#allocation4] sm:$0x1] %vm43_vm0, %v303_v0  ;;  %211 = vmatprep.subr.mxu0 %v303_v0  ;;  %213 = vmatprep.mubr.msk.f32.mxu0 %vm304_vm1, %v303_v0  ;;  %v47_v1 = vld [vmem:[#allocation5] sm:$0xff]  ;;  %v46_v2 = vld [vmem:[#allocation8] sm:$0x3]  ;;  %v305_v3 = vmov -inf   ;;  %v140_v15 = vlaneseq }
  0x1b   :  { %212 = vmatpush3.xpose.msk.msra.mxu0 %vm48_vm2, %v47_v1  ;;  %44 = vst.msk [vmem:[#allocation3] sm:$0x1] %vm43_vm0, %v305_v3  ;;  %v125_v4 = vld [vmem:[%s351_s2] sm:$0x1]  ;;  %vm130_vm4 = vcmask 57344   ;;  %v306_v10 = vmov 0  }
  0x1c   :  { %vm126_vm3 = vcmp.eq.s32.totalorder %v125_v4, 0  ;;  %223 = vset.pattern.permute.xlu0 %v306_v10  ;;  %224 = vset.pattern.permute.xlu1 %v306_v10  ;;  %v141_v16 = vshrl.u32 %v140_v15, 7  ;;  %s307_s2 = smov [#allocation10]  }
  0x1d   :  { %v127_v5 = vsel %vm126_vm3, -1e+30, %v303_v0  ;;  %s197_s22 = sshll.u32 %s307_s2, 4  ;;  %s198_s22 = int_to_ptr.vmem [resolvable:$true] %s197_s22 }
  0x1e   :  { %214 = vmatmul.mubr.msk.f32.vlgmr.msra.gmra.mxu0 %vm48_vm2, %v46_v2  ;;  %v142_v17 = vsub.s32 0, %v141_v16  ;;  %s275_s23 = scalar_lea.vmem %s198_s22, 16  ;;  %s279_s24 = scalar_lea.vmem %s198_s22, 32 }
  0x1f   :  { %p276_p10 = scmp.ne.s32.totalorder %s198_s22, %s275_s23  ;;  %p280_p11 = scmp.lt.s32.totalorder %s198_s22, %s198_s22 }
  0x20   :  { %p281_p12 = scmp.lt.s32.totalorder %s279_s24, %s275_s23 }
  0x21   :  { %v150_v28 = vld [vmem:[#allocation4] sm:$0x1] }
  0x22   :  { %v129_v11 = vld [vmem:[#allocation3] sm:$0x1]  ;;  %p282_p13 = por %p281_p12, %p280_p11 }
  0x24   :  { %p283_p0 = pnand %p282_p13, %p276_p10 }
  0xde   :  { %v121_v6 = vpop.f32.mrf.mxu0 }
  0xdf   :  { %v128_v7 = vadd.f32 %v127_v5, %v121_v6  ;;  %v161_v22 = vrot.slane %v121_v6, 1 }
  0xe0   :  { %v215_v8 = vpop.f32.mrf.mxu0 }
  0xe1   :  { %v131_v9 = vsel %vm130_vm4, %v128_v7, -inf }
  0xe2   :  { %132 = vmax.xlane.f32.xlu0 %v131_v9 }
 0x16b   :  { %v133_v12 = vpop.xlane.xlu0 %132 }
 0x16c   :  { %v134_v13 = vmax.f32 %v129_v11, %v133_v12 }
 0x16e   :  { %v147_v14 = vsub.f32 %v129_v11, %v134_v13  ;;  %158 = vst.msk [vmem:[#allocation3] sm:$0x1] %vm43_vm0, %v134_v13  ;;  %159 = vst.msk [vmem:[#allocation2] sm:$0x1] %vm43_vm0, %v134_v13  ;;  %137 = vperm.xlu0 %223, %v134_v13  }
 0x170   :  { %v148_v26 = vmul.f32 1.442695, %v147_v14 }
 0x175   :  { %v168_v30 = vld [vmem:[#allocation2] sm:$0x1]  ;;  %v169_v31 = vld [vmem:[#allocation3] sm:$0x1] }
 0x176   :  { %v170_v34 = vsub.f32 %v168_v30, %v169_v31 }
 0x178   :  { %v171_v35 = vmul.f32 1.442695, %v170_v34 }
 0x1e9   :  { %v138_v18 = vpop.permute.xlu0 %137 }
 0x1ea   :  { %v143_v19 = vrot.slane %v138_v18, %v142_v17 }
 0x1ec   :  { %v144_v20 = vsub.f32 %v128_v7, %v143_v19 }
 0x1ee   :  { %v145_v21 = vmul.f32 1.442695, %v144_v20 }
 0x1f0   :  { %225 = vpow2.f32 %v145_v21 }
 0x1f1   :  { %227 = vpow2.f32 %v148_v26 }
 0x1f2   :  { %229 = vpow2.f32 %v171_v35 }
 0x1fd   :  { %v226_v23 = vpop.eup %225 }
 0x1fe   :  { %v163_v24 = vmul.f32 %v226_v23, %v161_v22  ;;  %v152_v25 = vsel %vm130_vm4, %v226_v23, 0.0  ;;  %v228_v27 = vpop.eup %227 }
 0x1ff   :  { %153 = vadd.xlane.f32.xlu1 %v152_v25  ;;  %v151_v29 = vmul.f32 %v228_v27, %v150_v28  ;;  %v230_v37 = vpop.eup %229 }
 0x200   :  { %164 = vst.msk [vmem:[#allocation10] sm:$0x1] %vm130_vm4, %v163_v24 }
 0x207   :  { %v177_v42 = vld [vmem:[#allocation10] sm:$0x1] }
 0x288   :  { %v154_v32 = vpop.xlane.xlu1 %153 }
 0x289   :  { %v155_v33 = vadd.f32 %v154_v32, %v151_v29 }
 0x28b   :  { %157 = vst.msk [vmem:[#allocation4] sm:$0x1] %vm43_vm0, %v155_v33 }
 0x292   :  { %v173_v36 = vld [vmem:[#allocation4] sm:$0x1] }
 0x293   :  { %231 = vrcp.f32 %v173_v36 }
 0x2a0   :  { %v232_v38 = vpop.eup %231 }
 0x2a1   :  { %v176_v39 = vmul.f32 %v232_v38, %v230_v37 }
 0x2a3   :  { %180 = vperm.xlu1 %224, %v176_v39  }
 0x31e   :  { %v181_v40 = vpop.permute.xlu1 %180 }
 0x31f   :  { %v186_v41 = vrot.slane %v181_v40, %v142_v17 }
 0x321   :  { %v187_v43 = vmul.f32 %v186_v41, %v177_v42 }
 0x323   :  { %233 = vtanh.f32 %v187_v43 }
 0x330   :  { %v234_v44 = vpop.eup %233 }
 0x331   :  { %v189_v45 = vmul.f32 10.0, %v234_v44 }
 0x333   :  { %190 = vst.msk [vmem:[#allocation10] sm:$0x1] %vm130_vm4, %v189_v45 }
 0x334   :  { %286 = shalt.err (!%p283_p0)
}
 0x335   :  { %200 = dma.vmem_to_hbm [thread:$0]  %s198_s22, 16, %s352_s3, [#allocation7]  }
 0x336   :  { %299 = dma.done.wait [#allocation7], 16  }
 0x337   :  { %300 = vsyncadd [#allocation7], 4294967280 }
 0x338   :  { %204 = vsyncpa [#allocation6], 1 }
 0x339   :  { %205 = vsyncpa [#allocation9], 1 }
 0x33a   :  { %206 = vsyncpa [#allocation7], 1 }

</bundles_post_ra>
